<compile_context>
chip_gen: v5e
topology: v5e:2x2
jax: 0.10.0
libtpu: 0.0.40
codegen_flags: <defaults>
</compile_context>

<pallas_src>
import functools

import jax
import jax.numpy as jnp
from jax import lax
from jax.experimental import pallas as pl
from jax.experimental.pallas import tpu as pltpu


_EPS = 1e-7
_MIB = 1024 * 1024


def _vmem_capacity_bytes():
    """Per-core VMEM capacity; conservative fallback if query unavailable."""
    try:
        info = pltpu.get_tpu_info()
        cap = getattr(info, "vmem_capacity_bytes", None)
        if cap:
            return int(cap)
    except Exception:
        pass
    return 64 * _MIB  # smallest across generations (v7x per-TensorCore VMEM)


def _choose_tk(K, N, itemsize, target_tile_bytes):
    """K-tile size: a multiple of 1024 lanes, independent of K's factorization.

    The last (possibly partial) tile is handled with an in-kernel lane mask in
    the stats pass; the apply pass relies on Pallas clipping out-of-bounds
    reads/writes of the final partial block.
    """
    if K < 1024:
        # Single tile: block last dim == full array dim, legal for any K.
        return K
    max_tk = max(1024, (target_tile_bytes // max(1, N * itemsize)) // 1024 * 1024)
    k_up = -(-K // 1024) * 1024  # K rounded up to a multiple of 1024
    return min(max_tk, k_up)


# --------------------------------------------------------------------------- #
# Fused single-read kernel (row fits VMEM): stats + apply in one pass.
# --------------------------------------------------------------------------- #
def _gln_fused_kernel(y_ref, gamma_ref, beta_ref, o_ref, *, count):
    y = y_ref[...].astype(jnp.float32)                    # (1, N, K)
    cnt = jnp.float32(count)
    mean = jnp.sum(y) / cnt
    centered = y - mean
    var = jnp.sum(centered * centered) / cnt              # exact (y-mean)^2 form
    inv_std = lax.rsqrt(var + _EPS)
    scale = gamma_ref[...].astype(jnp.float32) * inv_std  # (1, N, 1)
    shift = beta_ref[...].astype(jnp.float32) - scale * mean
    o_ref[...] = (y * scale + shift).astype(o_ref.dtype)


# --------------------------------------------------------------------------- #
# Two-pass streaming path.
# --------------------------------------------------------------------------- #
def _gln_stats_kernel(y_ref, mean_ref, inv_ref, sum_ref, sq_ref, *,
                      count, k_total, tk, lane_blocked, mask_last):
    """Pass 1: per-batch streaming sum / sum-of-squares over K tiles."""
    k = pl.program_id(1)

    @pl.when(k == 0)
    def _init():
        sum_ref[...] = jnp.zeros_like(sum_ref)
        sq_ref[...] = jnp.zeros_like(sq_ref)

    if lane_blocked:
        # vreg-shaped accumulators: stream 128-lane blocks with pure VPU adds.
        # The single cross-lane/sublane reduction happens only in the finalize.
        s_acc = sum_ref[...]                               # (1, N, 128) f32
        q_acc = sq_ref[...]
        for b in range(tk // 128):
            blk = y_ref[:, :, pl.ds(b * 128, 128)].astype(jnp.float32)
            if mask_last:
                col = (lax.broadcasted_iota(jnp.int32, blk.shape, 2)
                       + k * tk + b * 128)
                blk = jnp.where(col < k_total, blk, 0.0)   # zero padded lanes
            s_acc = s_acc + blk
            q_acc = q_acc + blk * blk
        sum_ref[...] = s_acc
        sq_ref[...] = q_acc
    else:
        # Tiny / oddly-shaped fallback (single full-K tile, no masking needed).
        y = y_ref[...].astype(jnp.float32)
        sum_ref[...] += jnp.sum(y)
        sq_ref[...] += jnp.sum(y * y)

    @pl.when(k == pl.num_programs(1) - 1)
    def _finalize():
        cnt = jnp.float32(count)
        total = jnp.sum(sum_ref[...])
        total_sq = jnp.sum(sq_ref[...])
        mean = total / cnt
        # TODO(synk): E[x^2] - mean^2 can cancel when |mean| >> std; a
        # Welford/compensated update would track the reference more tightly.
        var = jnp.maximum(total_sq / cnt - mean * mean, 0.0)
        inv_std = lax.rsqrt(var + _EPS)
        mean_ref[...] = jnp.full(mean_ref.shape, mean, jnp.float32)
        inv_ref[...] = jnp.full(inv_ref.shape, inv_std, jnp.float32)


def _gln_apply_kernel(y_ref, scale_ref, shift_ref, o_ref):
    """Pass 2: out = y * scale + shift with pre-folded per-channel constants."""
    scale = scale_ref[...]                                 # (1, N, 1) f32
    shift = shift_ref[...]
    if y_ref.dtype == jnp.bfloat16:
        # bf16 VPU path (v6e/v7x): halves vreg pressure; harmless on v5e.
        o_ref[...] = (y_ref[...] * scale.astype(jnp.bfloat16)
                      + shift.astype(jnp.bfloat16)).astype(o_ref.dtype)
    else:
        y = y_ref[...].astype(jnp.float32)
        o_ref[...] = (y * scale + shift).astype(o_ref.dtype)


# --------------------------------------------------------------------------- #
# Wrapper / dispatch.
# --------------------------------------------------------------------------- #
def global_layer_norm(y, gamma, beta, *, tk=None, force_two_pass=False):
    """gLN forward.

    Args:
        y:     [M, N, K] (batch, channel, length)
        gamma: [1, N, 1]
        beta:  [1, N, 1]
        tk:    optional K tile size override for the two-pass path
        force_two_pass: skip the fused single-read fast path (testing)
    Returns:
        [M, N, K] normalized output, same dtype as y.
    """
    M, N, K = y.shape
    assert gamma.shape == (1, N, 1) and beta.shape == (1, N, 1)
    itemsize = y.dtype.itemsize
    vmem_cap = _vmem_capacity_bytes()

    # ---- Fast path: single HBM read + write when a (N, K) row fits VMEM. ----
    row_bytes = N * K * itemsize
    # 2x in + 2x out (double-buffered) + ~2 f32-sized working copies.
    fused_need = 4 * row_bytes + 2 * N * K * 4
    if not force_two_pass and fused_need <= int(0.7 * vmem_cap):
        vmem_limit = min(int(0.9 * vmem_cap), max(32 * _MIB, fused_need + 8 * _MIB))
        fused = functools.partial(_gln_fused_kernel, count=N * K)
        return pl.pallas_call(
            fused,
            out_shape=jax.ShapeDtypeStruct((M, N, K), y.dtype),
            grid_spec=pltpu.PrefetchScalarGridSpec(
                num_scalar_prefetch=0,
                grid=(M,),
                in_specs=[
                    pl.BlockSpec((1, N, K), lambda m: (m, 0, 0)),
                    pl.BlockSpec((1, N, 1), lambda m: (0, 0, 0)),
                    pl.BlockSpec((1, N, 1), lambda m: (0, 0, 0)),
                ],
                out_specs=pl.BlockSpec((1, N, K), lambda m: (m, 0, 0)),
            ),
            compiler_params=pltpu.CompilerParams(
                dimension_semantics=("parallel",),
                vmem_limit_bytes=vmem_limit,
            ),
        )(y, gamma, beta)

    # ---- Two-pass streaming path (row does not fit comfortably in VMEM). ----
    # Generation-aware tile target: ~6 MiB on v5e/v6e (128 MiB VMEM), ~4 MiB
    # on v7x (64 MiB/TC).
    target_tile_bytes = 6 * _MIB if vmem_cap >= 96 * _MIB else 4 * _MIB
    if tk is None:
        tk = _choose_tk(K, N, itemsize, target_tile_bytes)
    kt = -(-K // tk)
    lane_blocked = (tk % 128 == 0)
    mask_last = (K % tk != 0)
    assert lane_blocked or not mask_last, "partial tiles require TK % 128 == 0"
    # TODO(synk): if N is huge while K is small (not a ConvTasNet shape), the
    # (1, N, tk) tile itself could exceed VMEM; an N-tiled variant would cover it.

    acc_shape = (1, N, 128) if lane_blocked else (1, 1, 1)
    tile_bytes = N * tk * itemsize
    vmem_limit = min(int(0.9 * vmem_cap),
                     max(48 * _MIB, 5 * tile_bytes + 8 * _MIB))

    stats = functools.partial(
        _gln_stats_kernel, count=N * K, k_total=K, tk=tk,
        lane_blocked=lane_blocked, mask_last=mask_last)
    mean, inv_std = pl.pallas_call(
        stats,
        out_shape=(
            jax.ShapeDtypeStruct((M, 1, 1), jnp.float32),
            jax.ShapeDtypeStruct((M, 1, 1), jnp.float32),
        ),
        grid_spec=pltpu.PrefetchScalarGridSpec(
            num_scalar_prefetch=0,
            grid=(M, kt),
            in_specs=[pl.BlockSpec((1, N, tk), lambda m, k: (m, 0, k))],
            out_specs=[
                pl.BlockSpec((1, 1, 1), lambda m, k: (m, 0, 0)),
                pl.BlockSpec((1, 1, 1), lambda m, k: (m, 0, 0)),
            ],
            scratch_shapes=[
                pltpu.VMEM(acc_shape, jnp.float32),  # running partial sums
                pltpu.VMEM(acc_shape, jnp.float32),  # running partial sum-sq
            ],
        ),
        compiler_params=pltpu.CompilerParams(
            dimension_semantics=("parallel", "arbitrary"),
            vmem_limit_bytes=vmem_limit,
        ),
    )(y)
    # TODO(synk): on v7x (2 TCs/chip) pass 1 only parallelizes over M; a K-split
    # with per-core partial sums would keep both cores busy when M is 1-2.

    # Fold per-channel constants once (tiny (M, N, 1) op between passes).
    scale = gamma.astype(jnp.float32) * inv_std            # (M, N, 1)
    shift = beta.astype(jnp.float32) - scale * mean        # (M, N, 1)

    out = pl.pallas_call(
        _gln_apply_kernel,
        out_shape=jax.ShapeDtypeStruct((M, N, K), y.dtype),
        grid_spec=pltpu.PrefetchScalarGridSpec(
            num_scalar_prefetch=0,
            grid=(M, kt),
            in_specs=[
                pl.BlockSpec((1, N, tk), lambda m, k: (m, 0, k)),
                pl.BlockSpec((1, N, 1), lambda m, k: (m, 0, 0)),
                pl.BlockSpec((1, N, 1), lambda m, k: (m, 0, 0)),
            ],
            out_specs=pl.BlockSpec((1, N, tk), lambda m, k: (m, 0, k)),
        ),
        compiler_params=pltpu.CompilerParams(
            dimension_semantics=("parallel", "parallel"),
            vmem_limit_bytes=vmem_limit,
        ),
    )(y, scale, shift)
    return out


def _reference(y, gamma, beta):
    # Plain-JAX reference matching the PyTorch forward exactly.
    mean = jnp.mean(jnp.mean(y, axis=1, keepdims=True), axis=2, keepdims=True)
    var = jnp.mean(
        jnp.mean((y - mean) ** 2, axis=1, keepdims=True), axis=2, keepdims=True
    )
    return gamma * (y - mean) / jnp.sqrt(var + _EPS) + beta


if __name__ == "__main__":
    key = jax.random.PRNGKey(0)
    k1, k2, k3 = jax.random.split(key, 3)

    # 1) Small shapes consistent with the module (fused single-read path).
    M, N, K = 2, 4, 16
    y = jax.random.normal(k1, (M, N, K), dtype=jnp.float32)
    gamma = jnp.ones((1, N, 1), dtype=jnp.float32)   # reset_parameters(): fill_(1)
    beta = jnp.zeros((1, N, 1), dtype=jnp.float32)   # reset_parameters(): zero_()
    out = jax.block_until_ready(global_layer_norm(y, gamma, beta))
    ref = _reference(y, gamma, beta)
    assert jnp.allclose(out, ref, atol=1e-5, rtol=1e-5), "mismatch (fused path)"

    # 2) Two-pass path, single K tile, vreg-shaped accumulators.
    M2, N2, K2 = 2, 8, 256
    y2 = jax.random.normal(k2, (M2, N2, K2), dtype=jnp.float32) * 2.0 + 0.5
    gamma2 = jnp.ones((1, N2, 1), dtype=jnp.float32)
    beta2 = jnp.zeros((1, N2, 1), dtype=jnp.float32)
    out2 = jax.block_until_ready(
        global_layer_norm(y2, gamma2, beta2, force_two_pass=True))
    ref2 = _reference(y2, gamma2, beta2)
    assert jnp.allclose(out2, ref2, atol=1e-4, rtol=1e-4), "mismatch (two-pass)"

    # 3) Two-pass path, multiple K tiles with a masked partial last tile
    #    (K is NOT a multiple of the tile size).
    M3, N3, K3 = 2, 8, 2368
    y3 = jax.random.normal(k3, (M3, N3, K3), dtype=jnp.float32) * 1.5 + 0.3
    gamma3 = jnp.ones((1, N3, 1), dtype=jnp.float32)
    beta3 = jnp.zeros((1, N3, 1), dtype=jnp.float32)
    out3 = jax.block_until_ready(
        global_layer_norm(y3, gamma3, beta3, tk=1024, force_two_pass=True))
    ref3 = _reference(y3, gamma3, beta3)
    assert jnp.allclose(out3, ref3, atol=1e-4, rtol=1e-4), "mismatch (masked tile)"

    print("KERNEL_OK")
</pallas_src>

<mosaic_0001>
module attributes {stable_mosaic.version = 11 : i64} {
  func.func @_gln_fused_kernel(%arg0: i32, %arg1: memref<1x4x16xf32, #tpu.memory_space<vmem>>, %arg2: memref<1x4x1xf32, #tpu.memory_space<vmem>>, %arg3: memref<1x4x1xf32, #tpu.memory_space<vmem>>, %arg4: memref<1x4x16xf32, #tpu.memory_space<vmem>>) attributes {dimension_semantics = [#tpu.dimension_semantics<parallel>], iteration_bounds = array<i64: 2>, scalar_prefetch = 0 : i64, scratch_operands = 0 : i64, tpu.core_type = #tpu.core_type<tc>, window_params = [{transform_indices = @transform_0, window_bounds = array<i64: 1, 4, 16>}, {pipeline_mode = #tpu.pipeline_mode<synchronous>, transform_indices = @transform_1, window_bounds = array<i64: 1, 4, 1>}, {pipeline_mode = #tpu.pipeline_mode<synchronous>, transform_indices = @transform_2, window_bounds = array<i64: 1, 4, 1>}, {transform_indices = @transform_3, window_bounds = array<i64: 1, 4, 16>}]} {
    %c0 = arith.constant 0 : index
    %c0_0 = arith.constant 0 : index
    %c0_1 = arith.constant 0 : index
    %0 = vector.load %arg1[%c0, %c0_0, %c0_1] : memref<1x4x16xf32, #tpu.memory_space<vmem>>, vector<1x4x16xf32>
    %1 = vector.shape_cast %0 : vector<1x4x16xf32> to vector<1x1x4x16xf32>
    %cst = arith.constant dense<0.000000e+00> : vector<1xf32>
    %2 = vector.multi_reduction <add>, %1, %cst [1, 2, 3] : vector<1x1x4x16xf32> to vector<1xf32>
    %3 = vector.shape_cast %2 : vector<1xf32> to vector<1x1x1x1xf32>
    %4 = vector.extract %3[0, 0, 0, 0] : f32 from vector<1x1x1x1xf32>
    %cst_2 = arith.constant 6.400000e+01 : f32
    %5 = arith.divf %4, %cst_2 : f32
    %6 = vector.broadcast %5 : f32 to vector<1x4x16xf32>
    %7 = arith.subf %0, %6 : vector<1x4x16xf32>
    %8 = arith.mulf %7, %7 : vector<1x4x16xf32>
    %9 = vector.shape_cast %8 : vector<1x4x16xf32> to vector<1x1x4x16xf32>
    %cst_3 = arith.constant dense<0.000000e+00> : vector<1xf32>
    %10 = vector.multi_reduction <add>, %9, %cst_3 [1, 2, 3] : vector<1x1x4x16xf32> to vector<1xf32>
    %11 = vector.shape_cast %10 : vector<1xf32> to vector<1x1x1x1xf32>
    %12 = vector.extract %11[0, 0, 0, 0] : f32 from vector<1x1x1x1xf32>
    %cst_4 = arith.constant 6.400000e+01 : f32
    %13 = arith.divf %12, %cst_4 : f32
    %cst_5 = arith.constant 1.000000e-07 : f32
    %14 = arith.addf %13, %cst_5 : f32
    %15 = math.rsqrt %14 : f32
    %c0_6 = arith.constant 0 : index
    %c0_7 = arith.constant 0 : index
    %c0_8 = arith.constant 0 : index
    %16 = vector.load %arg2[%c0_6, %c0_7, %c0_8] : memref<1x4x1xf32, #tpu.memory_space<vmem>>, vector<1x4x1xf32>
    %17 = vector.broadcast %15 : f32 to vector<1x4x1xf32>
    %18 = arith.mulf %16, %17 : vector<1x4x1xf32>
    %c0_9 = arith.constant 0 : index
    %c0_10 = arith.constant 0 : index
    %c0_11 = arith.constant 0 : index
    %19 = vector.load %arg3[%c0_9, %c0_10, %c0_11] : memref<1x4x1xf32, #tpu.memory_space<vmem>>, vector<1x4x1xf32>
    %20 = vector.broadcast %5 : f32 to vector<1x4x1xf32>
    %21 = arith.mulf %18, %20 : vector<1x4x1xf32>
    %22 = arith.subf %19, %21 : vector<1x4x1xf32>
    %23 = vector.broadcast %18 : vector<1x4x1xf32> to vector<1x4x16xf32>
    %24 = arith.mulf %0, %23 : vector<1x4x16xf32>
    %25 = vector.broadcast %22 : vector<1x4x1xf32> to vector<1x4x16xf32>
    %26 = arith.addf %24, %25 : vector<1x4x16xf32>
    %c0_12 = arith.constant 0 : index
    %c0_13 = arith.constant 0 : index
    %c0_14 = arith.constant 0 : index
    %27 = vector.load %arg4[%c0_12, %c0_13, %c0_14] : memref<1x4x16xf32, #tpu.memory_space<vmem>>, vector<1x4x16xf32>
    tpu.vector_store %arg4[%c0_12, %c0_13, %c0_14], %26 {strides = array<i32>} : memref<1x4x16xf32, #tpu.memory_space<vmem>>, vector<1x4x16xf32>,
    return
  }
  func.func @transform_0(%arg0: i32) -> (i32, i32, i32) {
    %c0_i32 = arith.constant 0 : i32
    %c0_i32_0 = arith.constant 0 : i32
    %c0_i32_1 = arith.constant 0 : i32
    return %arg0, %c0_i32, %c0_i32_0 : i32, i32, i32
  }
  func.func @transform_1(%arg0: i32) -> (i32, i32, i32) {
    %c0_i32 = arith.constant 0 : i32
    %c0_i32_0 = arith.constant 0 : i32
    %c0_i32_1 = arith.constant 0 : i32
    %c0_i32_2 = arith.constant 0 : i32
    return %c0_i32, %c0_i32_0, %c0_i32_1 : i32, i32, i32
  }
  func.func @transform_2(%arg0: i32) -> (i32, i32, i32) {
    %c0_i32 = arith.constant 0 : i32
    %c0_i32_0 = arith.constant 0 : i32
    %c0_i32_1 = arith.constant 0 : i32
    %c0_i32_2 = arith.constant 0 : i32
    return %c0_i32, %c0_i32_0, %c0_i32_1 : i32, i32, i32
  }
  func.func @transform_3(%arg0: i32) -> (i32, i32, i32) {
    %c0_i32 = arith.constant 0 : i32
    %c0_i32_0 = arith.constant 0 : i32
    %c0_i32_1 = arith.constant 0 : i32
    return %arg0, %c0_i32, %c0_i32_0 : i32, i32, i32
  }
}

</mosaic_0001>

<bundles_post_ra>
// kernel: tpu_custom_call.1
= control target key start
LH: loop header
LB: loop body
LE: loop exit
PB: predicated region body
PF: predicated region fallthrough
CT: control target
= control target key end

     0   :  { %8 = vsyncpa [#allocation3], 0  ;;  %s566_s0 = inlined_call_operand.vmem [shape: f32[2,4,16], index: 0, kind: input, shape index: {}]   ;;  %s567_s1 = inlined_call_operand.vmem [shape: f32[1,4,1], index: 1, kind: input, shape index: {}]   ;;  %s568_s2 = inlined_call_operand.vmem [shape: f32[1,4,1], index: 2, kind: input, shape index: {}]   ;;  %s569_s3 = inlined_call_operand.hbm [shape: f32[2,4,16], index: 3, kind: output, shape index: {}]  }
   0x1   :  { %10 = vsyncpa [#allocation3 + $0x1], 0  ;;  %s467_s12 = smov 0   ;;  %s469_s13 = smov 0  }
   0x2   :  { %s471_s14 = smov 0   ;;  %s473_s15 = smov 0  }
   0x3 LB: > { %s488_s16 = sadd.s32 4294967295, %s443_s15   ;;  %s316_s17 = sadd.s32 4294967294, %s443_s15   ;;  %s443_s15 = sphi %s473_s15, %s575_s15   ;;  %s439_s14 = sphi %s471_s14, %s574_s14   ;;  %s435_s13 = sphi %s469_s13, %s573_s13   ;;  %s431_s12 = sphi %s467_s12, %s572_s12  }
   0x4   : > { %s492_s18 = sadd.s32 1, %s443_s15   ;;  %s91_s19 = sadd.s32 1, %s439_s14 }
   0x5   : > { %s88_s20 = ssub.s32 %s443_s15, %s492_s18  ;;  %p101_p0 = scmp.ne.s32.totalorder %s439_s14, %s435_s13 }
   0x6   : > { %p89_p1 = scmp.eq.s32.totalorder %s88_s20, 0  ;;  %p102_p2 = scmp.eq.s32.totalorder %s488_s16, 1 }
   0x7   : > { %p107_p3 = scmp.ne.s32.totalorder %s435_s13, %s431_s12  ;;  %p108_p4 = scmp.eq.s32.totalorder %s316_s17, 1 }
   0x8   : > { %s503_s21 = scalar_select %p89_p1, %s439_s14, %s91_s19  }
   0x9   : > { %p505_p5 = por %p102_p2, %p101_p0  ;;  %p509_p6 = por %p108_p4, %p107_p3 }
   0xa   : > { %p319_p7 = scmp.ge.s32.totalorder %s443_s15, 1  ;;  %p139_p8 = scmp.lt.s32.totalorder %s443_s15, 3 }
   0xc   : > { %p140_p9 = pnand %p319_p7, %p139_p8 }
   0xd   : > { %p162_p10 = scmp.lt.s32.totalorder (!%p140_p9), %s488_s16, 1  ;;  %s159_s19 = sand.u32 (!%p140_p9), 1, %s435_s13  }
   0xe   : > { %143 = sbr.rel (%p140_p9) target bundleno = 594 (0x252), region = 32  ;;  %s320_s20 = sshll.u32 (!%p140_p9), %s159_s19, 2 }
   0xf   : > { %s401_s8 = scalar_lea.hbm (!%p140_p9), %s569_s3, 8 }
  0x13   : > { %s163_s24 = scalar_select %p162_p10, %s488_s16, 1  ;;  %vm167_vm0 = vcmask 125952   ;;  %v445_v2 = vmov 64.0   ;;  %v446_v35 = vmov 0   ;;  %v222_v36 = vld [vmem:[%s567_s1] sm:$0xf] }
  0x14   : > { %377 = vrcp.f32 %v445_v2  ;;  %375 = vset.pattern.permute.xlu1 %v446_v35  ;;  %376 = vset.pattern.permute.xlu0 %v446_v35  ;;  %v225_v40 = vld [vmem:[%s568_s2] sm:$0xf] }
  0x15   : > { %s321_s25 = sshll.u32 %s163_s24, 2  ;;  %s323_s24 = sshll.u32 %s488_s16, 2 }
  0x16   : > { %s165_s28 = scalar_lea.vmem %s566_s0, %s321_s25  ;;  %s252_s27 = scalar_lea.hbm %s569_s3, %s323_s24 }
  0x17   : > { %v520_v0 = vld [vmem:[%s165_s28] sm:$0xf]  ;;  %s161_s28 = scalar_lea.vmem [#allocation2], %s320_s20 }
  0x18   : > { %v168_v1 = vsel %vm167_vm0, %v520_v0, 0.0 }
  0x19   : > { %169 = vadd.xlane.f32.xlu0 %v168_v1 }
  0x1a   : > { %v378_v3 = vpop.eup %377 }
  0x1b   : > { %v179_v4 = vmul.f32 64.0, %v378_v3  ;;  %vm183_vm1 = vweird.f32 %v378_v3 }
  0x1d   : > { %v180_v5 = vsub.f32 1.0, %v179_v4 }
  0x1f   : > { %v181_v9 = vmul.f32 %v378_v3, %v180_v5 }
  0x21   : > { %v182_v12 = vadd.f32 %v378_v3, %v181_v9 }
  0x23   : > { %v184_v15 = vsel %vm183_vm1, %v378_v3, %v182_v12 }
  0x8c   : > { %v170_v6 = vpop.xlane.xlu0 %169 }
  0x8d   : > { %v171_v7 = vrot.slane %v170_v6, 4 }
  0x8f   : > { %v172_v8 = vadd.f32 %v171_v7, %v170_v6 }
  0x91   : > { %v173_v10 = vrot.slane %v172_v8, 2 }
  0x93   : > { %v174_v11 = vadd.f32 %v173_v10, %v172_v8 }
  0x95   : > { %v175_v13 = vrot.slane %v174_v11, 1 }
  0x97   : > { %v176_v14 = vadd.f32 %v175_v13, %v174_v11 }
  0x99   : > { %326 = vpush %v176_v14 }
  0x9a   : > { %328 = vpush %v184_v15 }
  0xca   : > { %s327_s29 = spop %326 }
  0xcb   : > { %s329_s30 = spop %328 }
  0xcc   : > { %s186_s4 = smul.f32 %s329_s30, %s327_s29  ;;  %s254_s29 = sshll.u32 %s161_s28, 4  ;;  %s255_s29 = int_to_ptr.vmem [resolvable:$true] %s254_s29 }
  0xce   : > { %v187_v16 = vstv %s186_s4  ;;  %s242_s4 = scalar_lea.sflag [#allocation3], %s159_s19 }
  0xcf   : > { %v188_v17 = vsub.f32 %v520_v0, %v187_v16 }
  0xd1   : > { %v189_v18 = vmul.f32 %v188_v17, %v188_v17 }
  0xd3   : > { %v190_v19 = vsel %vm167_vm0, %v189_v18, 0.0 }
  0xd4   : > { %191 = vadd.xlane.f32.xlu0 %v190_v19 }
 0x147   : > { %v192_v20 = vpop.xlane.xlu0 %191 }
 0x148   : > { %v193_v21 = vrot.slane %v192_v20, 4 }
 0x14a   : > { %v194_v22 = vadd.f32 %v193_v21, %v192_v20 }
 0x14c   : > { %v195_v23 = vrot.slane %v194_v22, 2 }
 0x14e   : > { %v196_v24 = vadd.f32 %v195_v23, %v194_v22 }
 0x150   : > { %v197_v25 = vrot.slane %v196_v24, 1 }
 0x152   : > { %v198_v26 = vadd.f32 %v197_v25, %v196_v24 }
 0x154   : > { %330 = vpush %v198_v26 }
 0x185   : > { %s331_s5 = spop %330 }
 0x186   : > { %s208_s6 = smul.f32 %s331_s5, %s329_s30  ;;  %s256_s30 = sshll.u32 %s252_s27, 4  ;;  %s257_s30 = int_to_ptr.hbm [resolvable:$true] %s256_s30 }
 0x187   : > { %s395_s5 = sshra.s32 %s257_s30, 4  ;;  %s396_s5 = int_to_ptr.hbm [resolvable:$true] %s395_s5 }
 0x188   : > { %s209_s7 = sadd.f32 1e-07, %s208_s6  ;;  %s397_s16 = scalar_lea.hbm %s396_s5, 4 }
 0x189   : > { %p398_p11 = scmp.ne.s32.totalorder %s396_s5, %s397_s16  ;;  %p402_p0 = scmp.lt.s32.totalorder %s396_s5, %s569_s3 }
 0x18a   : > { %v210_v27 = vstv %s209_s7  ;;  %p403_p1 = scmp.lt.s32.totalorder %s401_s8, %s397_s16 }
 0x18b   : > { %379 = vrsqrt.f32 %v210_v27  ;;  %vm217_vm3 = vweird.f32 %v210_v27  ;;  %p399_p12 = pnand %p398_p11, %p505_p5 }
 0x18c   : > { %p404_p2 = por %p403_p1, %p402_p0 }
 0x18d   : > { %p400_p13 = pneg %p399_p12 }
 0x18f   : > { %p405_p3 = pnand %p404_p2, %p400_p13 }
 0x191   : > { %v380_v28 = vpop.eup %379 }
 0x192   : > { %v212_v29 = vmul.f32 %v380_v28, %v210_v27  ;;  %vm218_vm2 = vweird.f32 %v380_v28 }
 0x193   : > { %vm219_vm4 = vmor %vm217_vm3, %vm218_vm2 }
 0x194   : > { %v213_v30 = vmul.f32 %v380_v28, %v212_v29 }
 0x196   : > { %v214_v31 = vmul.f32 0.5, %v213_v30 }
 0x198   : > { %v215_v32 = vsub.f32 1.5, %v214_v31 }
 0x19a   : > { %v216_v33 = vmul.f32 %v380_v28, %v215_v32 }
 0x19c   : > { %v220_v34 = vsel %vm219_vm4, %v380_v28, %v216_v33 }
 0x19d   : > { %332 = vpush %v220_v34 }
 0x1ce   : > { %s333_s10 = spop %332 }
 0x1cf   : > { %v223_v37 = vstv %s333_s10 }
 0x1d0   : > { %v224_v38 = vmul.f32 %v223_v37, %v222_v36 }
 0x1d2   : > { %230 = vperm.xlu1 %375, %v224_v38   ;;  %v226_v39 = vmul.f32 %v224_v38, %v187_v16 }
 0x1d4   : > { %v227_v41 = vsub.f32 %v225_v40, %v226_v39 }
 0x1da   : > { %236 = vperm.xlu1 %375, %v227_v41  }
 0x244   : > { %v231_v42 = vpop.permute.xlu1 %230 }
 0x245   : > { %v233_v43 = vmul.f32 %v231_v42, %v520_v0 }
 0x24c   : > { %v237_v44 = vpop.permute.xlu1 %236 }
 0x24d   : > { %v239_v45 = vadd.f32 %v237_v44, %v233_v43 }
 0x24f   : > { %240 = vst.msk [vmem:[%s161_s28] sm:$0xf] %vm167_vm0, %v239_v45 }
 0x250   : > { %408 = shalt.err (!%p405_p3)
}
 0x251   : > { %334 = dma.vmem_to_hbm [thread:$0]  (%p505_p5), %s255_s29, 64, %s257_s30, %s242_s4  }
 0x252 PF: > { %p340_p4 = scmp.ge.s32.totalorder %s443_s15, 2  ;;  %s268_s11 = sand.u32 1, %s431_s12  }
 0x253   : > { %s269_s17 = scalar_lea.sflag [#allocation3], %s268_s11 }
 0x254   : > { %p337_p7 = pnand %p340_p4, %p509_p6 }
 0x256   : > { %p338_p8 = pneg %p337_p7 }
 0x258   : > { %426 = dma.done.wait (%p338_p8), %s269_s17, 64  }
 0x259   : > { %428 = vsyncadd (%p338_p8), %s269_s17, 4294967232  ;;  %p13_p9 = scmp.ge.s32.totalorder %s492_s18, 4   ;;  %s572_s12 = smov %s435_s13 }
 0x25a   : > { %s573_s13 = smov %s439_s14  ;;  %s574_s14 = smov %s503_s21 }
 0x25b   : > { %s575_s15 = smov %s492_s18  ;;  %15 = sbr.rel (!%p13_p9) target bundleno = 3 (0x3), region = 67 }
 0x260   :  { %275 = vsyncpa [#allocation3], 1 }
 0x261   :  { %277 = vsyncpa [#allocation3 + $0x1], 1 }

</bundles_post_ra>
